<compile_context>
chip_gen: v6e
topology: v6e:2x2x1
jax: 0.10.0
libtpu: 0.0.40
codegen_flags: <defaults>
</compile_context>

<pallas_src>
import math

import jax
import jax.numpy as jnp
from jax.experimental import pallas as pl
from jax.experimental.pallas import tpu as pltpu

EPS = 1e-5
NEG_SLOPE = 0.1

# Packed parameter slab (8, 256), unused lanes zero:
#   row 0: w1  [0:128]      row 4: be2 [0:256]
#   row 1: g1  [0:128]      row 5: g3  [0:128]
#   row 2: be1 [0:128]      row 6: be3 [0:128]
#   row 3: g2  [0:256]      row 7: w4t [0:128], b4 at lane 128


def _bn_train_fused(h, gamma, beta):
    """PyTorch BatchNorm1d (training mode), as one fused scale/shift over h."""
    mu = jnp.mean(h, axis=0, keepdims=True)        # (1, C)  sublane reduce (XLU)
    ms = jnp.mean(h * h, axis=0, keepdims=True)    # (1, C)
    var = jnp.maximum(ms - mu * mu, 0.0)           # biased batch variance
    a = gamma * jax.lax.rsqrt(var + EPS)           # (1, C)  -- EUP rsqrt
    c = beta - mu * a                              # (1, C)
    return h * a + c                               # one full (B, C) FMA-ish pass


def _leaky_relu(h):
    # max(h, s*h) == LeakyReLU(h) for 0 < s < 1.
    return jnp.maximum(h, NEG_SLOPE * h)


def ballistic_kernel(x_ref, slab_ref, w2_ref, w3_ref, o_ref):
    x = x_ref[...]                                 # (B, 1)
    slab = slab_ref[...]                           # (8, 256) packed params

    w1, g1, be1 = slab[0:1, :128], slab[1:2, :128], slab[2:3, :128]
    g2, be2 = slab[3:4, :], slab[4:5, :]
    g3, be3 = slab[5:6, :128], slab[6:7, :128]
    w4t, b4 = slab[7:8, :128], slab[7:8, 128:129]  # (1,128), (1,1)

    # --- Layer 1: Linear(1,128) + BN1, collapsed -----------------------------
    # in_features == 1 and the bias cancels under training-mode BN, so
    #   mean_j(h) = w1_j * mean(x),   var_j(h) = w1_j^2 * var(x)
    # => h1 = x*a1 + c1  with  a1 = g1*w1*rsqrt(w1^2*var(x)+eps),
    #                          c1 = be1 - mean(x)*a1.
    mean_x = jnp.mean(x, keepdims=True)                    # (1, 1)
    var_x = jnp.mean((x - mean_x) ** 2, keepdims=True)     # (1, 1), two-pass
    a1 = g1 * w1 * jax.lax.rsqrt(w1 * w1 * var_x + EPS)    # (1, 128)
    c1 = be1 - mean_x * a1                                 # (1, 128)
    h = _leaky_relu(x * a1 + c1)                           # (B, 128) single pass

    # --- Layer 2: Linear(128,256) on the MXU (bias cancels in BN) ------------
    h = jnp.dot(h, w2_ref[...], preferred_element_type=jnp.float32)
    h = _leaky_relu(_bn_train_fused(h, g2, be2))           # (B, 256)

    # --- Layer 3: Linear(256,128) on the MXU (bias cancels in BN) ------------
    h = jnp.dot(h, w3_ref[...], preferred_element_type=jnp.float32)
    h = _leaky_relu(_bn_train_fused(h, g3, be3))           # (B, 128)

    # --- Layer 4: Linear(128,1) as a lane reduction ---------------------------
    # TODO(synk): on the large-B tiled path move this to the MXU with a
    # lane-dense output slab; at small B the XLU reduce is free.
    o_ref[...] = jnp.sum(h * w4t, axis=-1, keepdims=True) + b4


def ballistic_net(x, params):
    B = x.shape[0]
    vmem = pl.BlockSpec(memory_space=pltpu.MemorySpace.VMEM)
    return pl.pallas_call(
        ballistic_kernel,
        out_shape=jax.ShapeDtypeStruct((B, 1), jnp.float32),
        in_specs=[vmem, vmem, vmem, vmem],
        out_specs=vmem,
        # Footprint is well under 1 MiB here; 32 MiB also respects the v7x
        # per-core budget (64 MiB physical VMEM) for the future tiled path.
        compiler_params=pltpu.CompilerParams(vmem_limit_bytes=32 * 1024 * 1024),
    )(x, params["slab"], params["w2"], params["w3"])


def _pack_params(w1, g1, be1, g2, be2, g3, be3, w4t, b4):
    """Pack the nine tiny parameters into one (8, 256) slab (one DMA)."""
    def row(v):
        return jnp.pad(v, ((0, 0), (0, 256 - v.shape[1])))
    last = jnp.zeros((1, 256), jnp.float32)
    last = last.at[0, :128].set(w4t[0]).at[0, 128].set(b4[0, 0])
    return jnp.concatenate(
        [row(w1), row(g1), row(be1), row(g2), row(be2), row(g3), row(be3), last],
        axis=0)                                            # (8, 256)


def init_params(key):
    """Deterministic init matching BallisticNet.__init__ shapes.

    Linear: U(-1/sqrt(fan_in), 1/sqrt(fan_in)) for weight & bias (PyTorch-style).
    BatchNorm: weight=1, bias=0 (PyTorch default).
    Weights stored transposed as (in, out); final layer stored as a (1, 128) row.
    b1/b2/b3 exist only for the reference -- the kernel never sees them.
    """
    def linear(key, fan_in, fan_out):
        kw, kb = jax.random.split(key)
        bound = 1.0 / math.sqrt(fan_in)
        w = jax.random.uniform(kw, (fan_in, fan_out), jnp.float32, -bound, bound)
        b = jax.random.uniform(kb, (1, fan_out), jnp.float32, -bound, bound)
        return w, b

    k1, k2, k3, k4 = jax.random.split(key, 4)
    w1, b1 = linear(k1, 1, 128)
    w2, b2 = linear(k2, 128, 256)
    w3, b3 = linear(k3, 256, 128)
    w4, b4 = linear(k4, 128, 1)

    g1, be1 = jnp.ones((1, 128), jnp.float32), jnp.zeros((1, 128), jnp.float32)
    g2, be2 = jnp.ones((1, 256), jnp.float32), jnp.zeros((1, 256), jnp.float32)
    g3, be3 = jnp.ones((1, 128), jnp.float32), jnp.zeros((1, 128), jnp.float32)
    w4t = w4.T                      # (1, 128) row for the final lane reduction
    b4 = b4.reshape(1, 1)

    return dict(
        w1=w1, b1=b1, g1=g1, be1=be1,
        w2=w2, b2=b2, g2=g2, be2=be2,
        w3=w3, b3=b3, g3=g3, be3=be3,
        w4t=w4t, b4=b4,
        slab=_pack_params(w1, g1, be1, g2, be2, g3, be3, w4t, b4),
    )


def reference(x, p):
    """PyTorch-faithful forward (biases applied, two-pass BN, where-form LeakyReLU)."""
    def bn(h, gamma, beta):
        mu = jnp.mean(h, axis=0, keepdims=True)
        var = jnp.mean((h - mu) ** 2, axis=0, keepdims=True)
        return (h - mu) * jax.lax.rsqrt(var + EPS) * gamma + beta

    def lrelu(h):
        return jnp.where(h > 0, h, NEG_SLOPE * h)

    h = x @ p["w1"] + p["b1"]
    h = lrelu(bn(h, p["g1"], p["be1"]))
    h = h @ p["w2"] + p["b2"]
    h = lrelu(bn(h, p["g2"], p["be2"]))
    h = h @ p["w3"] + p["b3"]
    h = lrelu(bn(h, p["g3"], p["be3"]))
    return h @ p["w4t"].T + p["b4"]


if __name__ == "__main__":
    key = jax.random.PRNGKey(0)
    kp, kx = jax.random.split(key)
    params = init_params(kp)

    B = 32
    x = jax.random.normal(kx, (B, 1), jnp.float32)  # ballistic input: single scalar feature

    out = ballistic_net(x, params)
    out = jax.block_until_ready(out)

    ref = reference(x, params)
    assert out.shape == (B, 1), out.shape
    assert jnp.allclose(out, ref, atol=1e-4, rtol=1e-4), \
        f"max abs diff {jnp.max(jnp.abs(out - ref))}"

    print("KERNEL_OK")
</pallas_src>

<mosaic_0001>
module attributes {stable_mosaic.version = 11 : i64} {
  func.func @ballistic_kernel(%arg0: memref<32x1xf32, #tpu.memory_space<vmem>>, %arg1: memref<8x256xf32, #tpu.memory_space<vmem>>, %arg2: memref<128x256xf32, #tpu.memory_space<vmem>>, %arg3: memref<256x128xf32, #tpu.memory_space<vmem>>, %arg4: memref<32x1xf32, #tpu.memory_space<vmem>>) attributes {dimension_semantics = [], scalar_prefetch = 0 : i64, scratch_operands = 0 : i64, tpu.core_type = #tpu.core_type<tc>} {
    %c0 = arith.constant 0 : index
    %c0_0 = arith.constant 0 : index
    %0 = vector.load %arg0[%c0, %c0_0] : memref<32x1xf32, #tpu.memory_space<vmem>>, vector<32x1xf32>
    %c0_1 = arith.constant 0 : index
    %c0_2 = arith.constant 0 : index
    %1 = vector.load %arg1[%c0_1, %c0_2] : memref<8x256xf32, #tpu.memory_space<vmem>>, vector<8x256xf32>
    %2 = vector.extract_strided_slice %1 {offsets = [0, 0], sizes = [1, 128], strides = [1, 1]} : vector<8x256xf32> to vector<1x128xf32>
    %3 = vector.extract_strided_slice %1 {offsets = [1, 0], sizes = [1, 128], strides = [1, 1]} : vector<8x256xf32> to vector<1x128xf32>
    %4 = vector.extract_strided_slice %1 {offsets = [2, 0], sizes = [1, 128], strides = [1, 1]} : vector<8x256xf32> to vector<1x128xf32>
    %5 = vector.extract_strided_slice %1 {offsets = [3, 0], sizes = [1, 256], strides = [1, 1]} : vector<8x256xf32> to vector<1x256xf32>
    %6 = vector.extract_strided_slice %1 {offsets = [4, 0], sizes = [1, 256], strides = [1, 1]} : vector<8x256xf32> to vector<1x256xf32>
    %7 = vector.extract_strided_slice %1 {offsets = [5, 0], sizes = [1, 128], strides = [1, 1]} : vector<8x256xf32> to vector<1x128xf32>
    %8 = vector.extract_strided_slice %1 {offsets = [6, 0], sizes = [1, 128], strides = [1, 1]} : vector<8x256xf32> to vector<1x128xf32>
    %9 = vector.extract_strided_slice %1 {offsets = [7, 0], sizes = [1, 128], strides = [1, 1]} : vector<8x256xf32> to vector<1x128xf32>
    %10 = vector.extract_strided_slice %1 {offsets = [7, 128], sizes = [1, 1], strides = [1, 1]} : vector<8x256xf32> to vector<1x1xf32>
    %11 = vector.shape_cast %0 : vector<32x1xf32> to vector<1x32x1xf32>
    %cst = arith.constant dense<0.000000e+00> : vector<1xf32>
    %12 = vector.multi_reduction <add>, %11, %cst [1, 2] : vector<1x32x1xf32> to vector<1xf32>
    %13 = vector.shape_cast %12 : vector<1xf32> to vector<1x1x1xf32>
    %14 = vector.extract %13[0, 0, 0] : f32 from vector<1x1x1xf32>
    %15 = vector.broadcast %14 : f32 to vector<1x1xf32>
    %cst_3 = arith.constant 3.200000e+01 : f32
    %16 = vector.broadcast %cst_3 : f32 to vector<1x1xf32>
    %17 = arith.divf %15, %16 : vector<1x1xf32>
    %18 = vector.broadcast %17 : vector<1x1xf32> to vector<32x1xf32>
    %19 = arith.subf %0, %18 : vector<32x1xf32>
    %20 = arith.mulf %19, %19 : vector<32x1xf32>
    %21 = vector.shape_cast %20 : vector<32x1xf32> to vector<1x32x1xf32>
    %cst_4 = arith.constant dense<0.000000e+00> : vector<1xf32>
    %22 = vector.multi_reduction <add>, %21, %cst_4 [1, 2] : vector<1x32x1xf32> to vector<1xf32>
    %23 = vector.shape_cast %22 : vector<1xf32> to vector<1x1x1xf32>
    %24 = vector.extract %23[0, 0, 0] : f32 from vector<1x1x1xf32>
    %25 = vector.broadcast %24 : f32 to vector<1x1xf32>
    %cst_5 = arith.constant 3.200000e+01 : f32
    %26 = vector.broadcast %cst_5 : f32 to vector<1x1xf32>
    %27 = arith.divf %25, %26 : vector<1x1xf32>
    %28 = arith.mulf %3, %2 : vector<1x128xf32>
    %29 = arith.mulf %2, %2 : vector<1x128xf32>
    %30 = vector.broadcast %27 : vector<1x1xf32> to vector<1x128xf32>
    %31 = arith.mulf %29, %30 : vector<1x128xf32>
    %cst_6 = arith.constant 9.99999974E-6 : f32
    %32 = vector.broadcast %cst_6 : f32 to vector<1x128xf32>
    %33 = arith.addf %31, %32 : vector<1x128xf32>
    %34 = math.rsqrt %33 : vector<1x128xf32>
    %35 = arith.mulf %28, %34 : vector<1x128xf32>
    %36 = vector.broadcast %17 : vector<1x1xf32> to vector<1x128xf32>
    %37 = arith.mulf %36, %35 : vector<1x128xf32>
    %38 = arith.subf %4, %37 : vector<1x128xf32>
    %39 = vector.broadcast %0 : vector<32x1xf32> to vector<32x128xf32>
    %40 = vector.broadcast %35 : vector<1x128xf32> to vector<32x128xf32>
    %41 = arith.mulf %39, %40 : vector<32x128xf32>
    %42 = vector.broadcast %38 : vector<1x128xf32> to vector<32x128xf32>
    %43 = arith.addf %41, %42 : vector<32x128xf32>
    %cst_7 = arith.constant 1.000000e-01 : f32
    %44 = vector.broadcast %cst_7 : f32 to vector<32x128xf32>
    %45 = arith.mulf %44, %43 : vector<32x128xf32>
    %46 = arith.maximumf %43, %45 : vector<32x128xf32>
    %c0_8 = arith.constant 0 : index
    %c0_9 = arith.constant 0 : index
    %47 = vector.load %arg2[%c0_8, %c0_9] : memref<128x256xf32, #tpu.memory_space<vmem>>, vector<128x256xf32>
    %cst_10 = arith.constant dense<0.000000e+00> : vector<32x256xf32>
    %48 = tpu.matmul %46, %47, %cst_10 {dimension_numbers = #tpu.dot_dimension_numbers<[1], [0], [0], [1], [0, 0, 1, 1], [], []>} : vector<32x128xf32>, vector<128x256xf32>, vector<32x256xf32> -> vector<32x256xf32>
    %cst_11 = arith.constant dense<0.000000e+00> : vector<256xf32>
    %49 = vector.multi_reduction <add>, %48, %cst_11 [0] : vector<32x256xf32> to vector<256xf32>
    %50 = vector.shape_cast %49 : vector<256xf32> to vector<1x256xf32>
    %cst_12 = arith.constant 3.200000e+01 : f32
    %51 = vector.broadcast %cst_12 : f32 to vector<1x256xf32>
    %52 = arith.divf %50, %51 : vector<1x256xf32>
    %53 = arith.mulf %48, %48 : vector<32x256xf32>
    %cst_13 = arith.constant dense<0.000000e+00> : vector<256xf32>
    %54 = vector.multi_reduction <add>, %53, %cst_13 [0] : vector<32x256xf32> to vector<256xf32>
    %55 = vector.shape_cast %54 : vector<256xf32> to vector<1x256xf32>
    %cst_14 = arith.constant 3.200000e+01 : f32
    %56 = vector.broadcast %cst_14 : f32 to vector<1x256xf32>
    %57 = arith.divf %55, %56 : vector<1x256xf32>
    %58 = arith.mulf %52, %52 : vector<1x256xf32>
    %59 = arith.subf %57, %58 : vector<1x256xf32>
    %cst_15 = arith.constant 0.000000e+00 : f32
    %60 = vector.broadcast %cst_15 : f32 to vector<1x256xf32>
    %61 = arith.maximumf %59, %60 : vector<1x256xf32>
    %cst_16 = arith.constant 9.99999974E-6 : f32
    %62 = vector.broadcast %cst_16 : f32 to vector<1x256xf32>
    %63 = arith.addf %61, %62 : vector<1x256xf32>
    %64 = math.rsqrt %63 : vector<1x256xf32>
    %65 = arith.mulf %5, %64 : vector<1x256xf32>
    %66 = arith.mulf %52, %65 : vector<1x256xf32>
    %67 = arith.subf %6, %66 : vector<1x256xf32>
    %68 = vector.broadcast %65 : vector<1x256xf32> to vector<32x256xf32>
    %69 = arith.mulf %48, %68 : vector<32x256xf32>
    %70 = vector.broadcast %67 : vector<1x256xf32> to vector<32x256xf32>
    %71 = arith.addf %69, %70 : vector<32x256xf32>
    %cst_17 = arith.constant 1.000000e-01 : f32
    %72 = vector.broadcast %cst_17 : f32 to vector<32x256xf32>
    %73 = arith.mulf %72, %71 : vector<32x256xf32>
    %74 = arith.maximumf %71, %73 : vector<32x256xf32>
    %c0_18 = arith.constant 0 : index
    %c0_19 = arith.constant 0 : index
    %75 = vector.load %arg3[%c0_18, %c0_19] : memref<256x128xf32, #tpu.memory_space<vmem>>, vector<256x128xf32>
    %cst_20 = arith.constant dense<0.000000e+00> : vector<32x128xf32>
    %76 = tpu.matmul %74, %75, %cst_20 {dimension_numbers = #tpu.dot_dimension_numbers<[1], [0], [0], [1], [0, 0, 1, 1], [], []>} : vector<32x256xf32>, vector<256x128xf32>, vector<32x128xf32> -> vector<32x128xf32>
    %cst_21 = arith.constant dense<0.000000e+00> : vector<128xf32>
    %77 = vector.multi_reduction <add>, %76, %cst_21 [0] : vector<32x128xf32> to vector<128xf32>
    %78 = vector.shape_cast %77 : vector<128xf32> to vector<1x128xf32>
    %cst_22 = arith.constant 3.200000e+01 : f32
    %79 = vector.broadcast %cst_22 : f32 to vector<1x128xf32>
    %80 = arith.divf %78, %79 : vector<1x128xf32>
    %81 = arith.mulf %76, %76 : vector<32x128xf32>
    %cst_23 = arith.constant dense<0.000000e+00> : vector<128xf32>
    %82 = vector.multi_reduction <add>, %81, %cst_23 [0] : vector<32x128xf32> to vector<128xf32>
    %83 = vector.shape_cast %82 : vector<128xf32> to vector<1x128xf32>
    %cst_24 = arith.constant 3.200000e+01 : f32
    %84 = vector.broadcast %cst_24 : f32 to vector<1x128xf32>
    %85 = arith.divf %83, %84 : vector<1x128xf32>
    %86 = arith.mulf %80, %80 : vector<1x128xf32>
    %87 = arith.subf %85, %86 : vector<1x128xf32>
    %cst_25 = arith.constant 0.000000e+00 : f32
    %88 = vector.broadcast %cst_25 : f32 to vector<1x128xf32>
    %89 = arith.maximumf %87, %88 : vector<1x128xf32>
    %cst_26 = arith.constant 9.99999974E-6 : f32
    %90 = vector.broadcast %cst_26 : f32 to vector<1x128xf32>
    %91 = arith.addf %89, %90 : vector<1x128xf32>
    %92 = math.rsqrt %91 : vector<1x128xf32>
    %93 = arith.mulf %7, %92 : vector<1x128xf32>
    %94 = arith.mulf %80, %93 : vector<1x128xf32>
    %95 = arith.subf %8, %94 : vector<1x128xf32>
    %96 = vector.broadcast %93 : vector<1x128xf32> to vector<32x128xf32>
    %97 = arith.mulf %76, %96 : vector<32x128xf32>
    %98 = vector.broadcast %95 : vector<1x128xf32> to vector<32x128xf32>
    %99 = arith.addf %97, %98 : vector<32x128xf32>
    %cst_27 = arith.constant 1.000000e-01 : f32
    %100 = vector.broadcast %cst_27 : f32 to vector<32x128xf32>
    %101 = arith.mulf %100, %99 : vector<32x128xf32>
    %102 = arith.maximumf %99, %101 : vector<32x128xf32>
    %103 = vector.broadcast %9 : vector<1x128xf32> to vector<32x128xf32>
    %104 = arith.mulf %102, %103 : vector<32x128xf32>
    %cst_28 = arith.constant dense<0.000000e+00> : vector<32xf32>
    %105 = vector.multi_reduction <add>, %104, %cst_28 [1] : vector<32x128xf32> to vector<32xf32>
    %106 = vector.shape_cast %105 : vector<32xf32> to vector<32x1xf32>
    %107 = vector.broadcast %10 : vector<1x1xf32> to vector<32x1xf32>
    %108 = arith.addf %106, %107 : vector<32x1xf32>
    %c0_29 = arith.constant 0 : index
    %c0_30 = arith.constant 0 : index
    %109 = vector.load %arg4[%c0_29, %c0_30] : memref<32x1xf32, #tpu.memory_space<vmem>>, vector<32x1xf32>
    tpu.vector_store %arg4[%c0_29, %c0_30], %108 {strides = array<i32>} : memref<32x1xf32, #tpu.memory_space<vmem>>, vector<32x1xf32>,
    return
  }
}

</mosaic_0001>

<bundles_post_ra>
// kernel: tpu_custom_call.1
= control target key start
LH: loop header
LB: loop body
LE: loop exit
PB: predicated region body
PF: predicated region fallthrough
CT: control target
= control target key end

     0   :  { %9 = vsyncpa [#allocation3], 0  ;;  %s879_s0 = inlined_call_operand.vmem [shape: f32[32,1], index: 0, kind: input, shape index: {}]   ;;  %s880_s1 = inlined_call_operand.vmem [shape: f32[8,256], index: 1, kind: input, shape index: {}]   ;;  %s881_s2 = inlined_call_operand.hbm [shape: f32[128,256], index: 2, kind: input, shape index: {}]   ;;  %s882_s3 = inlined_call_operand.hbm [shape: f32[256,128], index: 3, kind: input, shape index: {}]   ;;  %s883_s4 = inlined_call_operand.vmem [shape: f32[32,1], index: 4, kind: output, shape index: {}]  }
   0x1   :  { %10 = vsyncpa [#allocation5], 0  ;;  %s717_s15 = smov [#allocation2]  }
   0x2   :  { %s20_s16 = sshll.u32 %s717_s15, 4  ;;  %s21_s16 = int_to_ptr.vmem [resolvable:$true] %s20_s16 }
   0x3   :  { %s681_s17 = scalar_lea.vmem %s21_s16, 4096  ;;  %p686_p1 = scmp.lt.s32.totalorder %s21_s16, %s21_s16 }
   0x4   :  { %p682_p0 = scmp.ne.s32.totalorder %s21_s16, %s681_s17  ;;  %p687_p2 = scmp.lt.s32.totalorder %s681_s17, %s681_s17 }
   0x6   :  { %p688_p3 = por %p687_p2, %p686_p1 }
   0x8   :  { %p689_p4 = pnand %p688_p3, %p682_p0 }
   0xa   :  { %692 = shalt.err (!%p689_p4)
}
   0xb   :  { %s718_s18 = smov 256   ;;  %s719_s19 = smov 16  }
   0xc   :  { %26 = dma.hbm_to_vmem [thread:$0]  %s881_s2, 4096, %s21_s16, [#allocation3], %s718_s18, %s718_s18, %s719_s19  }
   0xd   :  { %s720_s22 = smov [#allocation4]  }
   0xe   :  { %s32_s23 = sshll.u32 %s720_s22, 4  ;;  %s33_s23 = int_to_ptr.vmem [resolvable:$true] %s32_s23 }
   0xf   :  { %s701_s24 = scalar_lea.vmem %s33_s23, 4096  ;;  %p706_p6 = scmp.lt.s32.totalorder %s33_s23, %s33_s23 }
  0x10   :  { %p702_p5 = scmp.ne.s32.totalorder %s33_s23, %s701_s24  ;;  %p707_p7 = scmp.lt.s32.totalorder %s701_s24, %s701_s24 }
  0x12   :  { %p708_p8 = por %p707_p7, %p706_p6 }
  0x14   :  { %p709_p9 = pnand %p708_p8, %p702_p5 }
  0x16   :  { %712 = shalt.err (!%p709_p9)
}
  0x17   :  { %s721_s25 = smov 128   ;;  %s722_s26 = smov 8  }
  0x18   :  { %38 = dma.hbm_to_vmem [thread:$0]  %s882_s3, 4096, %s33_s23, [#allocation5], %s721_s25, %s721_s25, %s722_s26  }
  0x19   :  { %713 = dma.done.wait [#allocation3], 4096  }
  0x1a   :  { %714 = vsyncadd [#allocation3], 4294963200 }
  0x1b   :  { %715 = dma.done.wait [#allocation5], 4096  }
  0x1c   :  { %716 = vsyncadd [#allocation5], 4294963200  ;;  %vm51_vm0 = vcmask 7168   ;;  %v45_v0 = vld [vmem:[%s879_s0] sm:$0xff]  ;;  %v46_v1 = vld [vmem:[%s879_s0 + $0x8] sm:$0xff]  ;;  %v723_v11 = vmov 0  }
  0x1d   :  { %v47_v2 = vld [vmem:[%s879_s0 + $0x10] sm:$0xff]  ;;  %v48_v3 = vld [vmem:[%s879_s0 + $0x18] sm:$0xff]  ;;  %v52_v4 = vsel %vm51_vm0, %v45_v0, 0.0  ;;  %v53_v5 = vsel %vm51_vm0, %v46_v1, 0.0  ;;  %663 = vset.pattern.permute.xlu1 %v723_v11  ;;  %664 = vset.pattern.permute.xlu0 %v723_v11  ;;  %v187_v38 = vld [vmem:[#allocation2 + $0xe8] sm:$0xff] }
  0x1e   :  { %v55_v6 = vsel %vm51_vm0, %v47_v2, 0.0  ;;  %v54_v7 = vadd.f32 %v53_v5, %v52_v4  ;;  %v57_v8 = vsel %vm51_vm0, %v48_v3, 0.0  ;;  %116 = vperm.xlu1 %663, %v45_v0   ;;  %v189_v36 = vld [vmem:[#allocation2 + $0xf8] sm:$0xff]  ;;  %v188_v37 = vld [vmem:[#allocation2 + $0xf0] sm:$0xff]  ;;  %v186_v39 = vld [vmem:[#allocation2 + $0xe0] sm:$0xff]  ;;  %v724_v4 = vmov 0.0  }
  0x1f   :  { %190 = vmatprep.subr.mxu0 %v189_v36  ;;  %v185_v40 = vld [vmem:[#allocation2 + $0xd8] sm:$0xff]  ;;  %v184_v41 = vld [vmem:[#allocation2 + $0xd0] sm:$0xff]  ;;  %v183_v42 = vld [vmem:[#allocation2 + $0xc8] sm:$0xff]  ;;  %254 = vmatprep.mubr.f32.mxu0 %v724_v4 }
  0x20   :  { %v56_v9 = vadd.f32 %v55_v6, %v54_v7  ;;  %191 = vmatpush1.msra.mxu0 %v188_v37  ;;  %v182_v43 = vld [vmem:[#allocation2 + $0xc0] sm:$0xff]  ;;  %v181_v44 = vld [vmem:[#allocation2 + $0xb8] sm:$0xff]  ;;  %v180_v45 = vld [vmem:[#allocation2 + $0xb0] sm:$0xff] }
  0x21   :  { %192 = vmatprep.subr.mxu0 %v187_v38  ;;  %v179_v46 = vld [vmem:[#allocation2 + $0xa8] sm:$0xff]  ;;  %v178_v47 = vld [vmem:[#allocation2 + $0xa0] sm:$0xff]  ;;  %v177_v48 = vld [vmem:[#allocation2 + $0x98] sm:$0xff] }
  0x22   :  { %v58_v10 = vadd.f32 %v57_v8, %v56_v9  ;;  %121 = vperm.xlu1 %663, %v46_v1   ;;  %193 = vmatpush1.msra.mxu0 %v186_v39  ;;  %v176_v49 = vld [vmem:[#allocation2 + $0x90] sm:$0xff]  ;;  %v175_v50 = vld [vmem:[#allocation2 + $0x88] sm:$0xff]  ;;  %v174_v51 = vld [vmem:[#allocation2 + $0x80] sm:$0xff] }
  0x23   :  { %194 = vmatprep.subr.mxu0 %v185_v40  ;;  %v173_v52 = vld [vmem:[#allocation2 + $0x78] sm:$0xff]  ;;  %v172_v53 = vld [vmem:[#allocation2 + $0x70] sm:$0xff]  ;;  %v171_v54 = vld [vmem:[#allocation2 + $0x68] sm:$0xff] }
  0x24   :  { %59 = vadd.xlane.f32.xlu0 %v58_v10  ;;  %195 = vmatpush1.msra.mxu0 %v184_v41  ;;  %v170_v55 = vld [vmem:[#allocation2 + $0x60] sm:$0xff]  ;;  %v169_v56 = vld [vmem:[#allocation2 + $0x58] sm:$0xff]  ;;  %v168_v57 = vld [vmem:[#allocation2 + $0x50] sm:$0xff] }
  0x25   :  { %196 = vmatprep.subr.mxu0 %v183_v42  ;;  %v167_v58 = vld [vmem:[#allocation2 + $0x48] sm:$0xff]  ;;  %v166_v59 = vld [vmem:[#allocation2 + $0x40] sm:$0xff]  ;;  %v165_v60 = vld [vmem:[#allocation2 + $0x38] sm:$0xff] }
  0x26   :  { %131 = vperm.xlu1 %663, %v48_v3   ;;  %197 = vmatpush1.msra.mxu0 %v182_v43  ;;  %v164_v61 = vld [vmem:[#allocation2 + $0x30] sm:$0xff]  ;;  %v163_v62 = vld [vmem:[#allocation2 + $0x28] sm:$0xff]  ;;  %v162_v63 = vld [vmem:[#allocation2 + $0x20] sm:$0xff] }
  0x27   :  { %198 = vmatprep.subr.mxu0 %v181_v44 }
  0x28   :  { %199 = vmatpush1.msra.mxu0 %v180_v45 }
  0x29   :  { %200 = vmatprep.subr.mxu0 %v179_v46 }
  0x2a   :  { %201 = vmatpush1.msra.mxu0 %v178_v47 }
  0x2b   :  { %202 = vmatprep.subr.mxu0 %v177_v48 }
  0x2c   :  { %203 = vmatpush1.msra.mxu0 %v176_v49 }
  0x2d   :  { %204 = vmatprep.subr.mxu0 %v175_v50 }
  0x2e   :  { %205 = vmatpush1.msra.mxu0 %v174_v51 }
  0x2f   :  { %206 = vmatprep.subr.mxu0 %v173_v52  ;;  %v428_v52 = vld [vmem:[#allocation4 + $0xf8] sm:$0xff] }
  0x30   :  { %207 = vmatpush1.msra.mxu0 %v172_v53  ;;  %607 = vmatprep.subr.mxu1 %v428_v52  ;;  %v412_v53 = vld [vmem:[#allocation4 + $0x78] sm:$0xff] }
  0x31   :  { %208 = vmatprep.subr.mxu0 %v171_v54  ;;  %608 = vmatpush3.msra.mxu1 %v412_v53  ;;  %v427_v54 = vld [vmem:[#allocation4 + $0xf0] sm:$0xff] }
  0x32   :  { %209 = vmatpush1.msra.mxu0 %v170_v55  ;;  %609 = vmatprep.subr.mxu1 %v427_v54  ;;  %v411_v55 = vld [vmem:[#allocation4 + $0x70] sm:$0xff] }
  0x33   :  { %210 = vmatprep.subr.mxu0 %v169_v56  ;;  %610 = vmatpush3.msra.mxu1 %v411_v55  ;;  %v426_v56 = vld [vmem:[#allocation4 + $0xe8] sm:$0xff] }
  0x34   :  { %211 = vmatpush1.msra.mxu0 %v168_v57  ;;  %611 = vmatprep.subr.mxu1 %v426_v56  ;;  %v410_v57 = vld [vmem:[#allocation4 + $0x68] sm:$0xff] }
  0x35   :  { %212 = vmatprep.subr.mxu0 %v167_v58  ;;  %612 = vmatpush3.msra.mxu1 %v410_v57  ;;  %v425_v58 = vld [vmem:[#allocation4 + $0xe0] sm:$0xff] }
  0x36   :  { %213 = vmatpush1.msra.mxu0 %v166_v59  ;;  %613 = vmatprep.subr.mxu1 %v425_v58  ;;  %v409_v59 = vld [vmem:[#allocation4 + $0x60] sm:$0xff] }
  0x37   :  { %214 = vmatprep.subr.mxu0 %v165_v60  ;;  %614 = vmatpush3.msra.mxu1 %v409_v59  ;;  %v424_v60 = vld [vmem:[#allocation4 + $0xd8] sm:$0xff] }
  0x38   :  { %215 = vmatpush1.msra.mxu0 %v164_v61  ;;  %615 = vmatprep.subr.mxu1 %v424_v60  ;;  %v408_v61 = vld [vmem:[#allocation4 + $0x58] sm:$0xff] }
  0x39   :  { %216 = vmatprep.subr.mxu0 %v163_v62  ;;  %616 = vmatpush3.msra.mxu1 %v408_v61  ;;  %v423_v62 = vld [vmem:[#allocation4 + $0xd0] sm:$0xff] }
  0x3a   :  { %217 = vmatpush1.msra.mxu0 %v162_v63  ;;  %617 = vmatprep.subr.mxu1 %v423_v62  ;;  %v407_v63 = vld [vmem:[#allocation4 + $0x50] sm:$0xff] }
  0x3b   :  { %618 = vmatpush3.msra.mxu1 %v407_v63 }
  0xad   :  { %v60_v12 = vpop.xlane.xlu0 %59 }
  0xae   :  { %v61_v13 = vrot.slane %v60_v12, 4 }
  0xb0   :  { %v62_v14 = vadd.f32 %v61_v13, %v60_v12  ;;  %v785_v12 = vld [vmem:[%s880_s1] sm:$0xff] }
  0xb1   :  { %v101_v13 = vmul.f32 %v785_v12, %v785_v12 }
  0xb2   :  { %v63_v15 = vrot.slane %v62_v14, 2 }
  0xb4   :  { %v64_v16 = vadd.f32 %v63_v15, %v62_v14 }
  0xb6   :  { %v65_v17 = vrot.slane %v64_v16, 1 }
  0xb8   :  { %v66_v18 = vadd.f32 %v65_v17, %v64_v16 }
  0xba   :  { %651 = vpush %v66_v18  ;;  %v98_v18 = vrot.slane %v785_v12, 7 }
  0xeb   :  { %s652_s0 = spop %651 }
  0xec   :  { %v68_v19 = vstv %s652_s0 }
  0xed   :  { %v772_v20 = vmul.f32 0.03125, %v68_v19  ;;  %v134_v19 = vlaneseq }
  0xef   :  { %v71_v21 = vsub.f32 %v45_v0, %v772_v20  ;;  %v72_v22 = vsub.f32 %v46_v1, %v772_v20  ;;  %v73_v23 = vsub.f32 %v47_v2, %v772_v20  ;;  %v74_v24 = vsub.f32 %v48_v3, %v772_v20  ;;  %v161_v0 = vld [vmem:[#allocation2 + $0x18] sm:$0xff]  ;;  %v160_v1 = vld [vmem:[#allocation2 + $0x10] sm:$0xff]  ;;  %v158_v3 = vld [vmem:[#allocation2] sm:$0xff] }
  0xf0   :  { %218 = vmatprep.subr.mxu0 %v161_v0  ;;  %v422_v0 = vld [vmem:[#allocation4 + $0xc8] sm:$0xff] }
  0xf1   :  { %v75_v25 = vmul.f32 %v71_v21, %v71_v21  ;;  %v76_v26 = vmul.f32 %v72_v22, %v72_v22  ;;  %v77_v27 = vmul.f32 %v73_v23, %v73_v23  ;;  %v78_v28 = vmul.f32 %v74_v24, %v74_v24  ;;  %219 = vmatpush1.msra.mxu0 %v160_v1  ;;  %v406_v1 = vld [vmem:[#allocation4 + $0x48] sm:$0xff] }
  0xf2   :  { %v100_v21 = vmul.f32 %v98_v18, %v785_v12  ;;  %v791_v22 = vshrl.u32 %v134_v19, 7  ;;  %619 = vmatprep.subr.mxu1 %v422_v0  ;;  %v398_v18 = vld [vmem:[#allocation4 + $0x8] sm:$0xff]  ;;  %v413_v19 = vld [vmem:[#allocation4 + $0x80] sm:$0xff] }
  0xf3   :  { %v79_v29 = vsel %vm51_vm0, %v75_v25, 0.0  ;;  %v80_v30 = vsel %vm51_vm0, %v76_v26, 0.0  ;;  %v82_v32 = vsel %vm51_vm0, %v77_v27, 0.0  ;;  %v84_v34 = vsel %vm51_vm0, %v78_v28, 0.0  ;;  %v117_v27 = vpop.permute.xlu1 %116  ;;  %620 = vmatpush3.msra.mxu1 %v406_v1 }
  0xf4   :  { %v81_v31 = vadd.f32 %v80_v30, %v79_v29  ;;  %v136_v26 = vsub.s32 1, %v791_v22  ;;  %v144_v30 = vsub.s32 2, %v791_v22 }
  0xf6   :  { %v83_v33 = vadd.f32 %v82_v32, %v81_v31 }
  0xf8   :  { %v85_v35 = vadd.f32 %v84_v34, %v83_v33  ;;  %v122_v33 = vpop.permute.xlu1 %121 }
  0xfa   :  { %86 = vadd.xlane.f32.xlu0 %v85_v35 }
  0xfc   :  { %v132_v42 = vpop.permute.xlu1 %131 }
 0x110   :  { %126 = vperm.xlu0 %664, %v47_v2   ;;  %v159_v2 = vld [vmem:[#allocation2 + $0x8] sm:$0xff] }
 0x111   :  { %220 = vmatprep.subr.mxu0 %v159_v2  ;;  %v421_v2 = vld [vmem:[#allocation4 + $0xc0] sm:$0xff] }
 0x112   :  { %221 = vmatpush1.msra.mxu0 %v158_v3  ;;  %621 = vmatprep.subr.mxu1 %v421_v2  ;;  %v405_v3 = vld [vmem:[#allocation4 + $0x40] sm:$0xff] }
 0x113   :  { %622 = vmatpush3.msra.mxu1 %v405_v3 }
 0x183   :  { %v87_v5 = vpop.xlane.xlu0 %86 }
 0x184   :  { %v88_v6 = vrot.slane %v87_v5, 4 }
 0x186   :  { %v89_v7 = vadd.f32 %v88_v6, %v87_v5  ;;  %v404_v5 = vld [vmem:[#allocation4 + $0x38] sm:$0xff]  ;;  %v419_v6 = vld [vmem:[#allocation4 + $0xb0] sm:$0xff] }
 0x188   :  { %v90_v8 = vrot.slane %v89_v7, 2 }
 0x18a   :  { %v91_v9 = vadd.f32 %v90_v8, %v89_v7  ;;  %v403_v7 = vld [vmem:[#allocation4 + $0x30] sm:$0xff]  ;;  %v418_v8 = vld [vmem:[#allocation4 + $0xa8] sm:$0xff] }
 0x18b   :  { %v127_v37 = vpop.permute.xlu0 %126 }
 0x18c   :  { %v92_v10 = vrot.slane %v91_v9, 1 }
 0x18e   :  { %v93_v11 = vadd.f32 %v92_v10, %v91_v9  ;;  %v402_v9 = vld [vmem:[#allocation4 + $0x28] sm:$0xff]  ;;  %v417_v10 = vld [vmem:[#allocation4 + $0xa0] sm:$0xff] }
 0x190   :  { %653 = vpush %v93_v11  ;;  %v401_v11 = vld [vmem:[#allocation4 + $0x20] sm:$0xff] }
 0x1c1   :  { %s654_s11 = spop %653 }
 0x1c2   :  { %v95_v14 = vstv %s654_s11 }
 0x1c3   :  { %v96_v15 = vmul.f32 0.03125, %v95_v14  ;;  %v400_v14 = vld [vmem:[#allocation4 + $0x18] sm:$0xff] }
 0x1c5   :  { %v102_v16 = vmul.f32 %v101_v13, %v96_v15  ;;  %v416_v13 = vld [vmem:[#allocation4 + $0x98] sm:$0xff]  ;;  %v415_v15 = vld [vmem:[#allocation4 + $0x90] sm:$0xff] }
 0x1c7   :  { %v103_v17 = vadd.f32 1e-05, %v102_v16  ;;  %v399_v16 = vld [vmem:[#allocation4 + $0x10] sm:$0xff] }
 0x1c9   :  { %665 = vrsqrt.f32 %v103_v17  ;;  %v414_v17 = vld [vmem:[#allocation4 + $0x88] sm:$0xff] }
 0x1d6   :  { %v666_v23 = vpop.eup %665 }
 0x1d7   :  { %v106_v24 = vrot.slane %v666_v23, 7 }
 0x1d9   :  { %v108_v25 = vmul.f32 %v106_v24, %v100_v21  ;;  %v397_v21 = vld [vmem:[#allocation4] sm:$0xff] }
 0x1db   :  { %v109_v28 = vmul.f32 %v108_v25, %v772_v20  ;;  %v137_v31 = vrot.slane %v108_v25, %v136_v26 }
 0x1dd   :  { %v111_v29 = vrot.slane %v109_v28, 7  ;;  %v138_v34 = vmul.f32 %v137_v31, %v117_v27  ;;  %v139_v36 = vmul.f32 %v137_v31, %v122_v33  ;;  %v140_v41 = vmul.f32 %v137_v31, %v127_v37 }
 0x1de   :  { %v141_v20 = vmul.f32 %v137_v31, %v132_v42 }
 0x1df   :  { %v113_v32 = vsub.f32 %v785_v12, %v111_v29 }
 0x1e1   :  { %v145_v35 = vrot.slane %v113_v32, %v144_v30 }
 0x1e3   :  { %v146_v38 = vadd.f32 %v145_v35, %v138_v34  ;;  %v147_v39 = vadd.f32 %v145_v35, %v139_v36  ;;  %v148_v44 = vadd.f32 %v145_v35, %v140_v41  ;;  %v149_v46 = vadd.f32 %v145_v35, %v141_v20 }
 0x1e5   :  { %v150_v40 = vmul.f32 0.1, %v146_v38  ;;  %v151_v43 = vmul.f32 0.1, %v147_v39  ;;  %v152_v47 = vmul.f32 0.1, %v148_v44 }
 0x1e6   :  { %v153_v49 = vmul.f32 0.1, %v149_v46 }
 0x1e7   :  { %v154_v45 = vmax.f32 %v146_v38, %v150_v40  ;;  %v155_v48 = vmax.f32 %v147_v39, %v151_v43  ;;  %v156_v50 = vmax.f32 %v148_v44, %v152_v47 }
 0x1e8   :  { %v157_v51 = vmax.f32 %v149_v46, %v153_v49 }
 0x1e9   :  { %255 = vmatmul.mubr.f32.vlgmr.msra.gmra.mxu0 %v154_v45 }
 0x1ea   :  { %260 = vmatprep.mubr.f32.mxu0 %v724_v4 }
 0x1ed   :  { %261 = vmatmul.mubr.f32.gmra.mxu0 %v155_v48 }
 0x1ee   :  { %266 = vmatprep.mubr.f32.mxu0 %v724_v4 }
 0x1f1   :  { %267 = vmatmul.mubr.f32.gmra.mxu0 %v156_v50 }
 0x1f2   :  { %272 = vmatprep.mubr.f32.mxu0 %v724_v4  ;;  %v420_v4 = vld [vmem:[#allocation4 + $0xb8] sm:$0xff] }
 0x1f3   :  { %623 = vmatprep.subr.mxu1 %v420_v4 }
 0x1f4   :  { %624 = vmatpush3.msra.mxu1 %v404_v5 }
 0x1f5   :  { %273 = vmatmul.mubr.f32.gmra.mxu0 %v157_v51  ;;  %625 = vmatprep.subr.mxu1 %v419_v6 }
 0x1f6   :  { %626 = vmatpush3.msra.mxu1 %v403_v7 }
 0x1f7   :  { %627 = vmatprep.subr.mxu1 %v418_v8 }
 0x1f8   :  { %628 = vmatpush3.msra.mxu1 %v402_v9 }
 0x1f9   :  { %629 = vmatprep.subr.mxu1 %v417_v10 }
 0x1fa   :  { %630 = vmatpush3.msra.mxu1 %v401_v11 }
 0x1fb   :  { %631 = vmatprep.subr.mxu1 %v416_v13 }
 0x1fc   :  { %632 = vmatpush3.msra.mxu1 %v400_v14 }
 0x1fd   :  { %633 = vmatprep.subr.mxu1 %v415_v15 }
 0x1fe   :  { %634 = vmatpush3.msra.mxu1 %v399_v16 }
 0x1ff   :  { %635 = vmatprep.subr.mxu1 %v414_v17 }
 0x200   :  { %636 = vmatpush3.msra.mxu1 %v398_v18 }
 0x201   :  { %637 = vmatprep.subr.mxu1 %v413_v19 }
 0x202   :  { %638 = vmatpush3.msra.mxu1 %v397_v21 }
 0x2a9   :  { %v797_v23 = vpop.f32.mrf.mxu0 }
 0x2aa   :  { %v299_v30 = vmul.f32 %v797_v23, %v797_v23 }
 0x2ab   :  { %v799_v24 = vpop.f32.mrf.mxu0 }
 0x2ac   :  { %v300_v33 = vmul.f32 %v799_v24, %v799_v24 }
 0x2ad   :  { %v801_v25 = vpop.f32.mrf.mxu0 }
 0x2ae   :  { %v301_v27 = vmul.f32 %v801_v25, %v801_v25  ;;  %v279_v31 = vadd.f32 %v801_v25, %v797_v23 }
 0x2af   :  { %v803_v26 = vpop.f32.mrf.mxu0 }
 0x2b0   :  { %v302_v28 = vmul.f32 %v803_v26, %v803_v26  ;;  %v307_v35 = vadd.f32 %v301_v27, %v299_v30  ;;  %v288_v36 = vadd.f32 %v803_v26, %v799_v24 }
 0x2b1   :  { %v809_v29 = vpop.f32.mrf.mxu0 }
 0x2b2   :  { %v303_v32 = vmul.f32 %v809_v29, %v809_v29  ;;  %v280_v37 = vadd.f32 %v279_v31, %v809_v29  ;;  %v316_v39 = vadd.f32 %v302_v28, %v300_v33  ;;  %v840_v31 = vld [vmem:[%s880_s1 + $0x8] sm:$0xff]  ;;  %v351_v33 = vsub.s32 3, %v791_v22 }
 0x2b3   :  { %v819_v34 = vpop.f32.mrf.mxu0 }
 0x2b4   :  { %v304_v38 = vmul.f32 %v819_v34, %v819_v34  ;;  %v308_v41 = vadd.f32 %v307_v35, %v303_v32  ;;  %v289_v42 = vadd.f32 %v288_v36, %v819_v34 }
 0x2b5   :  { %v826_v40 = vpop.f32.mrf.mxu0 }
 0x2b6   :  { %v281_v43 = vadd.f32 %v280_v37, %v826_v40  ;;  %v305_v44 = vmul.f32 %v826_v40, %v826_v40  ;;  %v317_v45 = vadd.f32 %v316_v39, %v304_v38 }
 0x2b7   :  { %v832_v20 = vpop.f32.mrf.mxu0 }
 0x2b8   :  { %v282_v46 = vrot.slane %v281_v43, 4  ;;  %v309_v47 = vadd.f32 %v308_v41, %v305_v44  ;;  %v290_v48 = vadd.f32 %v289_v42, %v832_v20  ;;  %v306_v49 = vmul.f32 %v832_v20, %v832_v20 }
 0x2b9   :  { %v367_v41 = vsub.s32 4, %v791_v22 }
 0x2ba   :  { %v283_v50 = vadd.f32 %v282_v46, %v281_v43  ;;  %v310_v51 = vrot.slane %v309_v47, 4  ;;  %v291_v52 = vrot.slane %v290_v48, 4  ;;  %v318_v53 = vadd.f32 %v317_v45, %v306_v49 }
 0x2bc   :  { %v284_v54 = vrot.slane %v283_v50, 2  ;;  %v311_v55 = vadd.f32 %v310_v51, %v309_v47  ;;  %v292_v56 = vadd.f32 %v291_v52, %v290_v48  ;;  %v319_v57 = vrot.slane %v318_v53, 4 }
 0x2be   :  { %v285_v58 = vadd.f32 %v284_v54, %v283_v50  ;;  %v312_v59 = vrot.slane %v311_v55, 2  ;;  %v293_v60 = vrot.slane %v292_v56, 2  ;;  %v320_v61 = vadd.f32 %v319_v57, %v318_v53 }
 0x2c0   :  { %v286_v62 = vrot.slane %v285_v58, 1  ;;  %v313_v63 = vadd.f32 %v312_v59, %v311_v55  ;;  %v294_v0 = vadd.f32 %v293_v60, %v292_v56  ;;  %v321_v1 = vrot.slane %v320_v61, 2 }
 0x2c2   :  { %v287_v2 = vadd.f32 %v286_v62, %v285_v58  ;;  %v314_v3 = vrot.slane %v313_v63, 1  ;;  %v295_v4 = vrot.slane %v294_v0, 1  ;;  %v322_v5 = vadd.f32 %v321_v1, %v320_v61 }
 0x2c4   :  { %v297_v6 = vmul.f32 0.03125, %v287_v2  ;;  %v315_v7 = vadd.f32 %v314_v3, %v313_v63  ;;  %v296_v8 = vadd.f32 %v295_v4, %v294_v0  ;;  %v323_v9 = vrot.slane %v322_v5, 1 }
 0x2c6   :  { %v325_v10 = vmul.f32 0.03125, %v315_v7  ;;  %v327_v11 = vmul.f32 %v297_v6, %v297_v6  ;;  %v298_v13 = vmul.f32 0.03125, %v296_v8  ;;  %v324_v14 = vadd.f32 %v323_v9, %v322_v5 }
 0x2c8   :  { %v329_v15 = vsub.f32 %v325_v10, %v327_v11  ;;  %v326_v16 = vmul.f32 0.03125, %v324_v14  ;;  %v328_v17 = vmul.f32 %v298_v13, %v298_v13 }
 0x2ca   :  { %v331_v18 = vmax.f32 %v329_v15, 0.0  ;;  %v330_v19 = vsub.f32 %v326_v16, %v328_v17 }
 0x2cc   :  { %v333_v21 = vadd.f32 1e-05, %v331_v18  ;;  %v332_v27 = vmax.f32 %v330_v19, 0.0 }
 0x2ce   :  { %667 = vrsqrt.f32 %v333_v21  ;;  %v334_v28 = vadd.f32 1e-05, %v332_v27 }
 0x2d0   :  { %669 = vrsqrt.f32 %v334_v28 }
 0x2db   :  { %v668_v30 = vpop.eup %667 }
 0x2dc   :  { %v337_v32 = vmul.f32 %v668_v30, %v785_v12 }
 0x2dd   :  { %v670_v35 = vpop.eup %669 }
 0x2de   :  { %v339_v36 = vmul.f32 %v337_v32, %v297_v6  ;;  %v338_v37 = vmul.f32 %v670_v35, %v840_v31  ;;  %v352_v39 = vrot.slane %v337_v32, %v351_v33 }
 0x2e0   :  { %v343_v38 = vrot.slane %v339_v36, 7  ;;  %v340_v42 = vmul.f32 %v338_v37, %v298_v13  ;;  %v356_v45 = vrot.slane %v338_v37, %v351_v33  ;;  %v357_v48 = vmul.f32 %v352_v39, %v797_v23 }
 0x2e1   :  { %v359_v53 = vmul.f32 %v352_v39, %v801_v25  ;;  %v361_v62 = vmul.f32 %v352_v39, %v809_v29  ;;  %v363_v3 = vmul.f32 %v352_v39, %v826_v40 }
 0x2e2   :  { %v347_v43 = vsub.f32 %v785_v12, %v343_v38  ;;  %v344_v44 = vrot.slane %v340_v42, 7  ;;  %v358_v50 = vmul.f32 %v356_v45, %v799_v24  ;;  %v360_v52 = vmul.f32 %v356_v45, %v803_v26 }
 0x2e3   :  { %v362_v56 = vmul.f32 %v356_v45, %v819_v34  ;;  %v364_v23 = vmul.f32 %v356_v45, %v832_v20 }
 0x2e4   :  { %v368_v46 = vrot.slane %v347_v43, %v367_v41  ;;  %v348_v47 = vsub.f32 %v840_v31, %v344_v44 }
 0x2e6   :  { %v372_v49 = vrot.slane %v348_v47, %v367_v41  ;;  %v373_v51 = vadd.f32 %v368_v46, %v357_v48  ;;  %v375_v58 = vadd.f32 %v368_v46, %v359_v53  ;;  %v377_v1 = vadd.f32 %v368_v46, %v361_v62 }
 0x2e7   :  { %v379_v34 = vadd.f32 %v368_v46, %v363_v3  ;;  %v551_v62 = vsub.s32 5, %v791_v22 }
 0x2e8   :  { %v374_v54 = vadd.f32 %v372_v49, %v358_v50  ;;  %v376_v55 = vadd.f32 %v372_v49, %v360_v52  ;;  %v381_v57 = vmul.f32 0.1, %v373_v51  ;;  %v378_v61 = vadd.f32 %v372_v49, %v362_v56 }
 0x2e9   :  { %v383_v0 = vmul.f32 0.1, %v375_v58  ;;  %v380_v26 = vadd.f32 %v372_v49, %v364_v23  ;;  %v385_v5 = vmul.f32 0.1, %v377_v1  ;;  %v387_v20 = vmul.f32 0.1, %v379_v34 }
 0x2ea   :  { %v382_v59 = vmul.f32 0.1, %v374_v54  ;;  %v384_v60 = vmul.f32 0.1, %v376_v55  ;;  %v389_v24 = vmax.f32 %v373_v51, %v381_v57  ;;  %v386_v2 = vmul.f32 0.1, %v378_v61 }
 0x2eb   :  { %v391_v4 = vmax.f32 %v375_v58, %v383_v0  ;;  %v388_v6 = vmul.f32 0.1, %v380_v26  ;;  %v393_v29 = vmax.f32 %v377_v1, %v385_v5  ;;  %v395_v9 = vmax.f32 %v379_v34, %v387_v20 }
 0x2ec   :  { %v390_v63 = vmax.f32 %v374_v54, %v382_v59  ;;  %v392_v25 = vmax.f32 %v376_v55, %v384_v60  ;;  %v394_v7 = vmax.f32 %v378_v61, %v386_v2  ;;  %v559_v0 = vsub.s32 6, %v791_v22 }
 0x2ed   :  { %v396_v8 = vmax.f32 %v380_v26, %v388_v6  ;;  %v575_v26 = vsub.s32 7, %v791_v22 }
 0x2ee   :  { %493 = vmatprep.mubr.f32.mxu1 %v390_v63 }
 0x2ef   :  { %494 = vmatmul.mubr.f32.vlgmr.msra.gmra.mxu1 %v389_v24 }
 0x2f0   :  { %498 = vmatprep.mubr.f32.mxu1 %v392_v25 }
 0x2f3   :  { %499 = vmatmul.mubr.f32.gmra.mxu1 %v391_v4 }
 0x2f4   :  { %503 = vmatprep.mubr.f32.mxu1 %v394_v7 }
 0x2f7   :  { %504 = vmatmul.mubr.f32.gmra.mxu1 %v393_v29  ;;  %v576_v29 = vrot.slane %v785_v12, %v575_v26 }
 0x2f8   :  { %508 = vmatprep.mubr.f32.mxu1 %v396_v8 }
 0x2fb   :  { %509 = vmatmul.mubr.f32.gmra.mxu1 %v395_v9 }
 0x3af   :  { %v639_v10 = vpop.f32.mrf.mxu1 }
 0x3b1   :  { %v640_v11 = vpop.f32.mrf.mxu1 }
 0x3b2   :  { %v641_v16 = vadd.f32 %v640_v11, %v639_v10 }
 0x3b3   :  { %v642_v13 = vpop.f32.mrf.mxu1 }
 0x3b4   :  { %v524_v27 = vmul.f32 %v641_v16, %v641_v16 }
 0x3b5   :  { %v643_v40 = vpop.f32.mrf.mxu1 }
 0x3b6   :  { %v644_v14 = vadd.f32 %v643_v40, %v642_v13 }
 0x3b7   :  { %v645_v15 = vpop.f32.mrf.mxu1 }
 0x3b8   :  { %v525_v18 = vmul.f32 %v644_v14, %v644_v14  ;;  %v514_v28 = vadd.f32 %v644_v14, %v641_v16 }
 0x3b9   :  { %v646_v17 = vpop.f32.mrf.mxu1 }
 0x3ba   :  { %v647_v19 = vadd.f32 %v646_v17, %v645_v15  ;;  %v528_v33 = vadd.f32 %v525_v18, %v524_v27 }
 0x3bb   :  { %v648_v21 = vpop.f32.mrf.mxu1 }
 0x3bc   :  { %v526_v30 = vmul.f32 %v647_v19, %v647_v19  ;;  %v515_v35 = vadd.f32 %v647_v19, %v514_v28 }
 0x3bd   :  { %v649_v32 = vpop.f32.mrf.mxu1 }
 0x3be   :  { %v650_v36 = vadd.f32 %v649_v32, %v648_v21  ;;  %v529_v37 = vadd.f32 %v528_v33, %v526_v30 }
 0x3c0   :  { %v516_v38 = vadd.f32 %v650_v36, %v515_v35  ;;  %v527_v39 = vmul.f32 %v650_v36, %v650_v36 }
 0x3c2   :  { %v517_v41 = vrot.slane %v516_v38, 4  ;;  %v530_v42 = vadd.f32 %v529_v37, %v527_v39 }
 0x3c4   :  { %v518_v43 = vadd.f32 %v517_v41, %v516_v38  ;;  %v531_v44 = vrot.slane %v530_v42, 4 }
 0x3c6   :  { %v519_v45 = vrot.slane %v518_v43, 2  ;;  %v532_v46 = vadd.f32 %v531_v44, %v530_v42 }
 0x3c8   :  { %v520_v47 = vadd.f32 %v519_v45, %v518_v43  ;;  %v533_v48 = vrot.slane %v532_v46, 2 }
 0x3ca   :  { %v521_v49 = vrot.slane %v520_v47, 1  ;;  %v534_v50 = vadd.f32 %v533_v48, %v532_v46 }
 0x3cc   :  { %v522_v51 = vadd.f32 %v521_v49, %v520_v47  ;;  %v535_v52 = vrot.slane %v534_v50, 1 }
 0x3ce   :  { %v523_v53 = vmul.f32 0.03125, %v522_v51  ;;  %v536_v54 = vadd.f32 %v535_v52, %v534_v50 }
 0x3d0   :  { %v537_v55 = vmul.f32 0.03125, %v536_v54  ;;  %v538_v56 = vmul.f32 %v523_v53, %v523_v53 }
 0x3d2   :  { %v539_v57 = vsub.f32 %v537_v55, %v538_v56 }
 0x3d4   :  { %v540_v58 = vmax.f32 %v539_v57, 0.0 }
 0x3d6   :  { %v541_v59 = vadd.f32 1e-05, %v540_v58 }
 0x3d8   :  { %671 = vrsqrt.f32 %v541_v59 }
 0x3e5   :  { %v672_v60 = vpop.eup %671 }
 0x3e6   :  { %v543_v61 = vmul.f32 %v672_v60, %v785_v12 }
 0x3e8   :  { %v544_v23 = vmul.f32 %v543_v61, %v523_v53  ;;  %v552_v24 = vrot.slane %v543_v61, %v551_v62 }
 0x3ea   :  { %v546_v63 = vrot.slane %v544_v23, 7  ;;  %v555_v25 = vmul.f32 %v647_v19, %v552_v24  ;;  %v553_v3 = vmul.f32 %v641_v16, %v552_v24  ;;  %v554_v34 = vmul.f32 %v644_v14, %v552_v24 }
 0x3eb   :  { %v556_v4 = vmul.f32 %v650_v36, %v552_v24  ;;  %v592_v19 = vrot.slane %v840_v31, %v575_v26 }
 0x3ec   :  { %v548_v1 = vsub.f32 %v785_v12, %v546_v63 }
 0x3ee   :  { %v560_v2 = vrot.slane %v548_v1, %v559_v0 }
 0x3f0   :  { %v563_v5 = vadd.f32 %v560_v2, %v555_v25  ;;  %v561_v6 = vadd.f32 %v560_v2, %v553_v3  ;;  %v562_v7 = vadd.f32 %v560_v2, %v554_v34  ;;  %v564_v10 = vadd.f32 %v560_v2, %v556_v4 }
 0x3f2   :  { %v567_v20 = vmul.f32 0.1, %v563_v5  ;;  %v565_v8 = vmul.f32 0.1, %v561_v6  ;;  %v566_v9 = vmul.f32 0.1, %v562_v7 }
 0x3f3   :  { %v568_v22 = vmul.f32 0.1, %v564_v10 }
 0x3f4   :  { %v571_v11 = vmax.f32 %v563_v5, %v567_v20  ;;  %v569_v13 = vmax.f32 %v561_v6, %v565_v8  ;;  %v570_v17 = vmax.f32 %v562_v7, %v566_v9 }
 0x3f5   :  { %v572_v14 = vmax.f32 %v564_v10, %v568_v22 }
 0x3f6   :  { %v579_v40 = vmul.f32 %v576_v29, %v571_v11  ;;  %v577_v15 = vmul.f32 %v576_v29, %v569_v13  ;;  %v578_v16 = vmul.f32 %v576_v29, %v570_v17 }
 0x3f7   :  { %v580_v18 = vmul.f32 %v576_v29, %v572_v14 }
 0x3f8   :  { %585 = vadd.xlane.f32.xlu0 %v579_v40  ;;  %581 = vadd.xlane.f32.xlu1 %v577_v15 }
 0x3fc   :  { %583 = vadd.xlane.f32.xlu1 %v578_v16 }
 0x400   :  { %587 = vadd.xlane.f32.xlu1 %v580_v18 }
 0x481   :  { %v586_v12 = vpop.xlane.xlu0 %585  ;;  %v582_v21 = vpop.xlane.xlu1 %581 }
 0x482   :  { %v595_v27 = vadd.f32 %v592_v19, %v586_v12  ;;  %v593_v28 = vadd.f32 %v592_v19, %v582_v21 }
 0x484   :  { %599 = vst.msk [vmem:[%s883_s4 + $0x10] sm:$0xff] %vm51_vm0, %v595_v27  ;;  %597 = vst.msk [vmem:[%s883_s4] sm:$0xff] %vm51_vm0, %v593_v28 }
 0x485   :  { %v584_v30 = vpop.xlane.xlu1 %583 }
 0x486   :  { %v594_v32 = vadd.f32 %v592_v19, %v584_v30 }
 0x488   :  { %598 = vst.msk [vmem:[%s883_s4 + $0x8] sm:$0xff] %vm51_vm0, %v594_v32 }
 0x489   :  { %v588_v31 = vpop.xlane.xlu1 %587 }
 0x48a   :  { %v596_v33 = vadd.f32 %v592_v19, %v588_v31 }
 0x48c   :  { %600 = vst.msk [vmem:[%s883_s4 + $0x18] sm:$0xff] %vm51_vm0, %v596_v33 }
 0x48d   :  { %605 = vsyncpa [#allocation3], 1 }
 0x48e   :  { %606 = vsyncpa [#allocation5], 1 }

</bundles_post_ra>
